<compile_context>
chip_gen: v7x
topology: tpu7x:2x2x1
jax: 0.10.0
libtpu: 0.0.40
codegen_flags: <defaults>
</compile_context>

<pallas_src>
import jax
import jax.numpy as jnp
from jax.experimental import pallas as pl
from jax.experimental.pallas import tpu as pltpu


def _round_up(x, m):
    return (x + m - 1) // m * m


def relconv_kernel(a_ref, xk_ref, xm_ref, w_ref, b_ref, o_ref, z_ref):
    """grid = (row_tiles, reduction_tiles); reduction axis is last ("arbitrary").

    a_ref : (TM, TK)   f32   mean-normalized combined adjacency tile
    xk_ref: (TK, Cp)   bf16  node features for the reduction tile
    xm_ref: (TM, Cp)   bf16  node features for the output-row tile
    w_ref : (2*Cp, Op) bf16  [Wr.T ; W1.T] packed, resident in VMEM
    b_ref : (1, Op)    f32   root bias, resident
    o_ref : (TM, Op)   f32   output tile
    z_ref : (TM, Cp)   f32   scratch accumulator for the (A_comb @ x) tile
    """
    k = pl.program_id(1)

    @pl.when(k == 0)
    def _init():
        z_ref[...] = jnp.zeros_like(z_ref)

    # Dominant work: one bf16 MXU matmul per reduction step, f32 accumulate.
    z_ref[...] += jnp.dot(
        a_ref[...].astype(jnp.bfloat16), xk_ref[...],
        preferred_element_type=jnp.float32)

    @pl.when(k == pl.num_programs(1) - 1)
    def _finalize():
        half = w_ref.shape[0] // 2
        root = jnp.dot(xm_ref[...], w_ref[pl.ds(0, half), :],
                       preferred_element_type=jnp.float32)
        agg = jnp.dot(z_ref[...].astype(jnp.bfloat16), w_ref[pl.ds(half, half), :],
                      preferred_element_type=jnp.float32)
        o_ref[...] = (root + agg + b_ref[...]).astype(o_ref.dtype)


@jax.jit
def relconv_forward(x, edge_index, w1, w_root, b_root):
    """x: [N, Cin] f32; edge_index: [2, E] int32; w1/w_root: [Cout, Cin]; b_root: [Cout]."""
    n, cin = x.shape
    cout = w1.shape[0]
    src, tgt = edge_index[0], edge_index[1]

    # ---- host-side glue: one mean-normalized adjacency for both directions ----
    #   A_comb[i, j] = #(tgt=i, src=j)/max(cnt_tgt[i],1) + #(src=i, tgt=j)/max(cnt_src[i],1)
    # so that  A_comb @ h == scatter_mean(h[src], tgt) + scatter_mean(h[tgt], src).
    a_s2t = jnp.zeros((n, n), jnp.float32).at[tgt, src].add(1.0)
    a_t2s = jnp.zeros((n, n), jnp.float32).at[src, tgt].add(1.0)
    cnt_tgt = jnp.zeros((n,), jnp.float32).at[tgt].add(1.0)
    cnt_src = jnp.zeros((n,), jnp.float32).at[src].add(1.0)
    a_comb = (a_s2t / jnp.maximum(cnt_tgt, 1.0)[:, None]
              + a_t2s / jnp.maximum(cnt_src, 1.0)[:, None])
    # TODO(synk): for large sparse graphs replace this dense O(N^2) build with a
    # CSR / block-sparse formulation via PrefetchScalarGridSpec scalar prefetch
    # (row offsets in SMEM, pl.when skip on empty blocks).

    # ---- padding: lane-dense features, tile-aligned node count ----
    cin_p = _round_up(cin, 128)
    cout_p = _round_up(cout, 128)
    tm = tk = min(512, _round_up(n, 128))   # tile fits VMEM on v5e/v6e/v7x
    n_pad = _round_up(n, tm)

    x_p = jnp.zeros((n_pad, cin_p), jnp.bfloat16).at[:n, :cin].set(x.astype(jnp.bfloat16))
    a_p = jnp.zeros((n_pad, n_pad), jnp.float32).at[:n, :n].set(a_comb)
    # Pack both weights into one resident operand: rows [0, cin_p) apply to x
    # (root), rows [cin_p, 2*cin_p) apply to the aggregated features (lin1).
    w_cat = jnp.zeros((2 * cin_p, cout_p), jnp.bfloat16)
    w_cat = w_cat.at[:cin, :cout].set(w_root.T.astype(jnp.bfloat16))
    w_cat = w_cat.at[cin_p:cin_p + cin, :cout].set(w1.T.astype(jnp.bfloat16))
    b_p = jnp.zeros((1, cout_p), jnp.float32).at[0, :cout].set(b_root)

    grid = (n_pad // tm, n_pad // tk)

    # VMEM budget: double-buffered in/out tiles + scratch accumulator + headroom.
    tile_bytes = (tm * tk * 4                 # adjacency tile (f32)
                  + tk * cin_p * 2            # x_k (bf16)
                  + tm * cin_p * 2            # x_m (bf16)
                  + 2 * cin_p * cout_p * 2    # packed weights (bf16)
                  + cout_p * 4                # bias
                  + tm * cout_p * 4)          # output tile (f32)
    vmem_limit = min(2 * (2 * tile_bytes + tm * cin_p * 4) + (8 << 20), 100 << 20)

    out = pl.pallas_call(
        relconv_kernel,
        out_shape=jax.ShapeDtypeStruct((n_pad, cout_p), jnp.float32),
        grid_spec=pltpu.PrefetchScalarGridSpec(
            num_scalar_prefetch=0,
            grid=grid,
            in_specs=[
                pl.BlockSpec((tm, tk), lambda i, k: (i, k)),             # A_comb tile
                pl.BlockSpec((tk, cin_p), lambda i, k: (k, 0)),          # x (reduction rows)
                pl.BlockSpec((tm, cin_p), lambda i, k: (i, 0)),          # x (output rows)
                pl.BlockSpec((2 * cin_p, cout_p), lambda i, k: (0, 0)),  # packed weights
                pl.BlockSpec((1, cout_p), lambda i, k: (0, 0)),          # bias
            ],
            out_specs=pl.BlockSpec((tm, cout_p), lambda i, k: (i, 0)),
            scratch_shapes=[pltpu.VMEM((tm, cin_p), jnp.float32)],
        ),
        compiler_params=pltpu.CompilerParams(
            dimension_semantics=("parallel", "arbitrary"),
            vmem_limit_bytes=int(vmem_limit),
        ),
    )(a_p, x_p, x_p, w_cat, b_p)

    return out[:n, :cout]


def _xavier_uniform(key, fan_out, fan_in):
    a = (6.0 / (fan_in + fan_out)) ** 0.5
    return jax.random.uniform(key, (fan_out, fan_in), jnp.float32, minval=-a, maxval=a)


def _reference(x, edge_index, w1, w_root, b_root):
    """Pure-JAX f32 reference mirroring the PyTorch module (lin2 unused in forward)."""
    n = x.shape[0]
    source, target = edge_index[0], edge_index[1]

    def scatter_mean(src_vals, index, dim_size):
        out = jnp.zeros((dim_size,) + src_vals.shape[1:], src_vals.dtype).at[index].add(src_vals)
        count = jnp.zeros((dim_size,), src_vals.dtype).at[index].add(1.0)
        return out / jnp.maximum(count, 1.0)[:, None]

    h = x @ w1.T
    s2t = scatter_mean(h[source], target, n)
    t2s = scatter_mean(h[target], source, n)
    return x @ w_root.T + b_root + s2t + t2s


if __name__ == "__main__":
    key = jax.random.PRNGKey(0)
    k_x, k_e1, k_e2, k_w1, k_w2, k_wr = jax.random.split(key, 6)

    num_nodes, num_edges = 16, 32
    in_channels, out_channels = 8, 16

    x = jax.random.normal(k_x, (num_nodes, in_channels), jnp.float32)
    edge_index = jnp.stack([
        jax.random.randint(k_e1, (num_edges,), 0, num_nodes, jnp.int32),
        jax.random.randint(k_e2, (num_edges,), 0, num_nodes, jnp.int32),
    ], axis=0)

    # Deterministic xavier-uniform parameter init (matches module shapes).
    w1 = _xavier_uniform(k_w1, out_channels, in_channels)      # lin1.weight
    _w2 = _xavier_uniform(k_w2, out_channels, in_channels)     # lin2.weight (unused in forward)
    w_root = _xavier_uniform(k_wr, out_channels, in_channels)  # root.weight
    b_root = jnp.zeros((out_channels,), jnp.float32)           # root.bias

    out = relconv_forward(x, edge_index, w1, w_root, b_root)
    out = jax.block_until_ready(out)

    ref = _reference(x, edge_index, w1, w_root, b_root)
    assert out.shape == (num_nodes, out_channels)
    # bf16 MXU operands -> relaxed tolerance vs the f32 reference.
    max_err = jnp.max(jnp.abs(out - ref))
    assert jnp.allclose(out, ref, atol=5e-2, rtol=5e-2), f"mismatch vs reference, max abs diff = {max_err}"

    print("KERNEL_OK")
</pallas_src>

<mosaic_0001>
module attributes {stable_mosaic.version = 11 : i64} {
  func.func private @main(%arg0: i32) attributes {dimension_semantics = [#tpu.dimension_semantics<core_parallel>], iteration_bounds = array<i64: 2>, tpu.core_type = #tpu.core_type<sc_scalar_subcore>, window_params = []} {
    return
  }
}

module attributes {stable_mosaic.version = 11 : i64} {
  func.func private @main(%arg0: i32) attributes {dimension_semantics = [#tpu.dimension_semantics<core_parallel>], iteration_bounds = array<i64: 2>, tpu.core_type = #tpu.core_type<sc_scalar_subcore>, window_params = []} {
    return
  }
}

module attributes {stable_mosaic.version = 11 : i64} {
  func.func @relconv_kernel(%arg0: i32, %arg1: i32, %arg2: memref<128x128xf32, #tpu.memory_space<vmem>>, %arg3: memref<128x128xbf16, #tpu.memory_space<vmem>>, %arg4: memref<128x128xbf16, #tpu.memory_space<vmem>>, %arg5: memref<256x128xbf16, #tpu.memory_space<vmem>>, %arg6: memref<1x128xf32, #tpu.memory_space<vmem>>, %arg7: memref<128x128xf32, #tpu.memory_space<vmem>>, %arg8: memref<128x128xf32, #tpu.memory_space<vmem>>) attributes {dimension_semantics = [#tpu.dimension_semantics<parallel>, #tpu.dimension_semantics<arbitrary>], iteration_bounds = array<i64: 1, 1>, scalar_prefetch = 0 : i64, scratch_operands = 1 : i64, tpu.core_type = #tpu.core_type<tc>, window_params = [{transform_indices = @transform_0, window_bounds = array<i64: 128, 128>}, {transform_indices = @transform_1, window_bounds = array<i64: 128, 128>}, {transform_indices = @transform_2, window_bounds = array<i64: 128, 128>}, {pipeline_mode = #tpu.pipeline_mode<synchronous>, transform_indices = @transform_3, window_bounds = array<i64: 256, 128>}, {pipeline_mode = #tpu.pipeline_mode<synchronous>, transform_indices = @transform_4, window_bounds = array<i64: 1, 128>}, {transform_indices = @transform_5, window_bounds = array<i64: 128, 128>}]} {
    %c0_i32 = arith.constant 0 : i32
    %0 = arith.cmpi eq, %arg1, %c0_i32 : i32
    %1 = arith.extui %0 : i1 to i32
    %c0_i32_0 = arith.constant 0 : i32
    %2 = arith.cmpi ne, %1, %c0_i32_0 : i32
    scf.if %2 {
      %cst_10 = arith.constant 0.000000e+00 : f32
      %13 = vector.broadcast %cst_10 : f32 to vector<128x128xf32>
      %c0_11 = arith.constant 0 : index
      %c0_12 = arith.constant 0 : index
      %14 = vector.load %arg8[%c0_11, %c0_12] : memref<128x128xf32, #tpu.memory_space<vmem>>, vector<128x128xf32>
      tpu.vector_store %arg8[%c0_11, %c0_12], %13 {strides = array<i32>} : memref<128x128xf32, #tpu.memory_space<vmem>>, vector<128x128xf32>,
    } else {
    }
    %c0 = arith.constant 0 : index
    %c0_1 = arith.constant 0 : index
    %3 = vector.load %arg8[%c0, %c0_1] : memref<128x128xf32, #tpu.memory_space<vmem>>, vector<128x128xf32>
    %c0_2 = arith.constant 0 : index
    %c0_3 = arith.constant 0 : index
    %4 = vector.load %arg2[%c0_2, %c0_3] : memref<128x128xf32, #tpu.memory_space<vmem>>, vector<128x128xf32>
    %5 = arith.truncf %4 : vector<128x128xf32> to vector<128x128xbf16>
    %c0_4 = arith.constant 0 : index
    %c0_5 = arith.constant 0 : index
    %6 = vector.load %arg3[%c0_4, %c0_5] : memref<128x128xbf16, #tpu.memory_space<vmem>>, vector<128x128xbf16>
    %cst = arith.constant dense<0.000000e+00> : vector<128x128xf32>
    %7 = tpu.matmul %5, %6, %cst {dimension_numbers = #tpu.dot_dimension_numbers<[1], [0], [0], [1], [0, 0, 1, 1], [], []>} : vector<128x128xbf16>, vector<128x128xbf16>, vector<128x128xf32> -> vector<128x128xf32>
    %8 = arith.addf %3, %7 : vector<128x128xf32>
    %c0_6 = arith.constant 0 : index
    %c0_7 = arith.constant 0 : index
    %9 = vector.load %arg8[%c0_6, %c0_7] : memref<128x128xf32, #tpu.memory_space<vmem>>, vector<128x128xf32>
    tpu.vector_store %arg8[%c0_6, %c0_7], %8 {strides = array<i32>} : memref<128x128xf32, #tpu.memory_space<vmem>>, vector<128x128xf32>,
    %c0_i32_8 = arith.constant 0 : i32
    %10 = arith.cmpi eq, %arg1, %c0_i32_8 : i32
    %11 = arith.extui %10 : i1 to i32
    %c0_i32_9 = arith.constant 0 : i32
    %12 = arith.cmpi ne, %11, %c0_i32_9 : i32
    scf.if %12 {
      %c0_10 = arith.constant 0 : index
      %c0_11 = arith.constant 0 : index
      %13 = vector.load %arg4[%c0_10, %c0_11] : memref<128x128xbf16, #tpu.memory_space<vmem>>, vector<128x128xbf16>
      %c0_12 = arith.constant 0 : index
      %c0_13 = arith.constant 0 : index
      %14 = vector.load %arg5[%c0_12, %c0_13] : memref<256x128xbf16, #tpu.memory_space<vmem>>, vector<128x128xbf16>
      %cst_14 = arith.constant dense<0.000000e+00> : vector<128x128xf32>
      %15 = tpu.matmul %13, %14, %cst_14 {dimension_numbers = #tpu.dot_dimension_numbers<[1], [0], [0], [1], [0, 0, 1, 1], [], []>} : vector<128x128xbf16>, vector<128x128xbf16>, vector<128x128xf32> -> vector<128x128xf32>
      %c0_15 = arith.constant 0 : index
      %c0_16 = arith.constant 0 : index
      %16 = vector.load %arg8[%c0_15, %c0_16] : memref<128x128xf32, #tpu.memory_space<vmem>>, vector<128x128xf32>
      %17 = arith.truncf %16 : vector<128x128xf32> to vector<128x128xbf16>
      %c128 = arith.constant 128 : index
      %c0_17 = arith.constant 0 : index
      %18 = vector.load %arg5[%c128, %c0_17] : memref<256x128xbf16, #tpu.memory_space<vmem>>, vector<128x128xbf16>
      %cst_18 = arith.constant dense<0.000000e+00> : vector<128x128xf32>
      %19 = tpu.matmul %17, %18, %cst_18 {dimension_numbers = #tpu.dot_dimension_numbers<[1], [0], [0], [1], [0, 0, 1, 1], [], []>} : vector<128x128xbf16>, vector<128x128xbf16>, vector<128x128xf32> -> vector<128x128xf32>
      %20 = arith.addf %15, %19 : vector<128x128xf32>
      %c0_19 = arith.constant 0 : index
      %c0_20 = arith.constant 0 : index
      %21 = vector.load %arg6[%c0_19, %c0_20] : memref<1x128xf32, #tpu.memory_space<vmem>>, vector<1x128xf32>
      %22 = vector.broadcast %21 : vector<1x128xf32> to vector<128x128xf32>
      %23 = arith.addf %20, %22 : vector<128x128xf32>
      %c0_21 = arith.constant 0 : index
      %c0_22 = arith.constant 0 : index
      %24 = vector.load %arg7[%c0_21, %c0_22] : memref<128x128xf32, #tpu.memory_space<vmem>>, vector<128x128xf32>
      tpu.vector_store %arg7[%c0_21, %c0_22], %23 {strides = array<i32>} : memref<128x128xf32, #tpu.memory_space<vmem>>, vector<128x128xf32>,
    } else {
    }
    return
  }
  func.func @transform_0(%arg0: i32, %arg1: i32) -> (i32, i32) {
    %c0_i32 = arith.constant 0 : i32
    return %arg0, %arg1 : i32, i32
  }
  func.func @transform_1(%arg0: i32, %arg1: i32) -> (i32, i32) {
    %c0_i32 = arith.constant 0 : i32
    %c0_i32_0 = arith.constant 0 : i32
    return %arg1, %c0_i32 : i32, i32
  }
  func.func @transform_2(%arg0: i32, %arg1: i32) -> (i32, i32) {
    %c0_i32 = arith.constant 0 : i32
    %c0_i32_0 = arith.constant 0 : i32
    return %arg0, %c0_i32 : i32, i32
  }
  func.func @transform_3(%arg0: i32, %arg1: i32) -> (i32, i32) {
    %c0_i32 = arith.constant 0 : i32
    %c0_i32_0 = arith.constant 0 : i32
    %c0_i32_1 = arith.constant 0 : i32
    return %c0_i32, %c0_i32_0 : i32, i32
  }
  func.func @transform_4(%arg0: i32, %arg1: i32) -> (i32, i32) {
    %c0_i32 = arith.constant 0 : i32
    %c0_i32_0 = arith.constant 0 : i32
    %c0_i32_1 = arith.constant 0 : i32
    return %c0_i32, %c0_i32_0 : i32, i32
  }
  func.func @transform_5(%arg0: i32, %arg1: i32) -> (i32, i32) {
    %c0_i32 = arith.constant 0 : i32
    %c0_i32_0 = arith.constant 0 : i32
    return %arg0, %c0_i32 : i32, i32
  }
}

</mosaic_0001>

<bundles_post_ra>
// kernel: relconv_forward.1
= control target key start
LH: loop header
LB: loop body
LE: loop exit
PB: predicated region body
PF: predicated region fallthrough
CT: control target
= control target key end

     0   :  { %s1244_s1 = inlined_call_operand.vmem [shape: bf16[128,128], index: 1, kind: input, shape index: {}, may-alias: {1,2}]   ;;  %s1245_s0 = inlined_call_operand.vmem [shape: f32[128,128], index: 0, kind: input, shape index: {}]   ;;  %s1246_s3 = inlined_call_operand.vmem [shape: bf16[256,128], index: 3, kind: input, shape index: {}]   ;;  %s1247_s2 = inlined_call_operand.vmem [shape: bf16[128,128], index: 2, kind: input, shape index: {}, may-alias: {1,2}]   ;;  %s1248_s4 = inlined_call_operand.vmem [shape: f32[1,128], index: 4, kind: input, shape index: {}]   ;;  %s1249_s5 = inlined_call_operand.vmem [shape: f32[128,128], index: 5, kind: output, shape index: {}]  }
   0x1   :  { %v939_v0 = vld [vmem:[%s1244_s1] sm:$0xff]   ;;  %v940_v1 = vld [vmem:[%s1244_s1 + $0x8] sm:$0xff]   ;;  %v941_v2 = vld [vmem:[%s1244_s1 + $0x10] sm:$0xff]  }
   0x2   :  { %811 = vmatprep.subr.bf16.mxu0 %v939_v0  ;;  %v942_v3 = vld [vmem:[%s1244_s1 + $0x18] sm:$0xff]   ;;  %v57_v4 = vld [vmem:[%s1245_s0] sm:$0xff]  ;;  %v58_v5 = vld [vmem:[%s1245_s0 + $0x8] sm:$0xff] }
   0x3   :  { %812 = vmatpush3.bf16.msra.mxu0 %v939_v0  ;;  %v73_v6 = vpack.c.bf16 %v58_v5, %v57_v4  ;;  %v943_v7 = vld [vmem:[%s1244_s1 + $0x20] sm:$0xff]   ;;  %v944_v9 = vld [vmem:[%s1244_s1 + $0x28] sm:$0xff]   ;;  %v951_v11 = vld [vmem:[%s1246_s3 + $0x50] sm:$0xff]  }
   0x4   :  { %813 = vmatprep.subr.bf16.mxu0 %v940_v1  ;;  %v947_v8 = vld [vmem:[%s1246_s3 + $0x40] sm:$0xff]   ;;  %v949_v10 = vld [vmem:[%s1246_s3 + $0x48] sm:$0xff]   ;;  %v945_v12 = vld [vmem:[%s1244_s1 + $0x30] sm:$0xff]  }
   0x5   :  { %827 = vmatprep.mubr.bf16.mxu0 %v73_v6  ;;  %843 = vmatprep.subr.bf16.mxu1 %v947_v8  ;;  %v953_v13 = vld [vmem:[%s1246_s3 + $0x58] sm:$0xff]   ;;  %v59_v15 = vld [vmem:[%s1245_s0 + $0x10] sm:$0xff]  ;;  %v61_v17 = vld [vmem:[%s1245_s0 + $0x20] sm:$0xff] }
   0x6   :  { %844 = vmatpush3.bf16.msra.mxu1 %v947_v8  ;;  %v946_v14 = vld [vmem:[%s1244_s1 + $0x38] sm:$0xff]   ;;  %v955_v18 = vld [vmem:[%s1246_s3 + $0x60] sm:$0xff]   ;;  %v62_v19 = vld [vmem:[%s1245_s0 + $0x28] sm:$0xff] }
   0x7   :  { %814 = vmatpush3.bf16.msra.mxu0 %v940_v1  ;;  %845 = vmatprep.subr.bf16.mxu1 %v949_v10  ;;  %v60_v16 = vld [vmem:[%s1245_s0 + $0x18] sm:$0xff]  ;;  %v1061_v20 = vld [vmem:[%s1246_s3] sm:$0xff]   ;;  %v957_v22 = vld [vmem:[%s1246_s3 + $0x68] sm:$0xff]   ;;  %v75_v23 = vpack.c.bf16 %v62_v19, %v61_v17 }
   0x8   :  { %815 = vmatprep.subr.bf16.mxu0 %v941_v2  ;;  %v74_v21 = vpack.c.bf16 %v60_v16, %v59_v15  ;;  %v1070_v24 = vld [vmem:[%s1246_s3 + $0x8] sm:$0xff]   ;;  %v959_v25 = vld [vmem:[%s1246_s3 + $0x70] sm:$0xff]   ;;  %v64_v27 = vld [vmem:[%s1245_s0 + $0x38] sm:$0xff] }
   0x9   :  { %v63_v26 = vld [vmem:[%s1245_s0 + $0x30] sm:$0xff]  ;;  %v65_v28 = vld [vmem:[%s1245_s0 + $0x40] sm:$0xff]  ;;  %v66_v29 = vld [vmem:[%s1245_s0 + $0x48] sm:$0xff] }
   0xa   :  { %846 = vmatpush3.bf16.msra.mxu1 %v949_v10  ;;  %v1092_v30 = vld [vmem:[%s1246_s3 + $0x10] sm:$0xff]   ;;  %v76_v31 = vpack.c.bf16 %v64_v27, %v63_v26  ;;  %v77_v32 = vpack.c.bf16 %v66_v29, %v65_v28  ;;  %v1099_v33 = vld [vmem:[%s1246_s3 + $0x18] sm:$0xff]   ;;  %v69_v36 = vld [vmem:[%s1245_s0 + $0x60] sm:$0xff] }
   0xb   :  { %816 = vmatpush3.bf16.msra.mxu0 %v941_v2  ;;  %847 = vmatprep.subr.bf16.mxu1 %v951_v11  ;;  %v67_v34 = vld [vmem:[%s1245_s0 + $0x50] sm:$0xff]  ;;  %v68_v35 = vld [vmem:[%s1245_s0 + $0x58] sm:$0xff]  ;;  %v70_v37 = vld [vmem:[%s1245_s0 + $0x68] sm:$0xff] }
   0xc   :  { %817 = vmatprep.subr.bf16.mxu0 %v942_v3  ;;  %v1118_v38 = vld [vmem:[%s1246_s3 + $0x20] sm:$0xff]   ;;  %v78_v39 = vpack.c.bf16 %v68_v35, %v67_v34  ;;  %v79_v40 = vpack.c.bf16 %v70_v37, %v69_v36  ;;  %v1125_v41 = vld [vmem:[%s1246_s3 + $0x28] sm:$0xff]   ;;  %v71_v42 = vld [vmem:[%s1245_s0 + $0x70] sm:$0xff] }
   0xd   :  { %v72_v43 = vld [vmem:[%s1245_s0 + $0x78] sm:$0xff]  ;;  %v1138_v44 = vld [vmem:[%s1246_s3 + $0x30] sm:$0xff]   ;;  %v963_v48 = vld [vmem:[%s1247_s2] sm:$0xff]  }
   0xe   :  { %848 = vmatpush3.bf16.msra.mxu1 %v951_v11  ;;  %v80_v45 = vpack.c.bf16 %v72_v43, %v71_v42  ;;  %v961_v46 = vld [vmem:[%s1246_s3 + $0x78] sm:$0xff]   ;;  %v964_v49 = vld [vmem:[%s1247_s2 + $0x8] sm:$0xff]   ;;  %v965_v50 = vld [vmem:[%s1247_s2 + $0x10] sm:$0xff]  }
   0xf   :  { %818 = vmatpush3.bf16.msra.mxu0 %v942_v3  ;;  %849 = vmatprep.subr.bf16.mxu1 %v953_v13  ;;  %v1149_v47 = vld [vmem:[%s1246_s3 + $0x38] sm:$0xff]  }
  0x10   :  { %819 = vmatprep.subr.bf16.mxu0 %v943_v7  ;;  %v966_v51 = vld [vmem:[%s1247_s2 + $0x18] sm:$0xff]  }
  0x11   :  { %v970_v15 = vld [vmem:[%s1247_s2 + $0x38] sm:$0xff]  }
  0x12   :  { %850 = vmatpush3.bf16.msra.mxu1 %v953_v13  ;;  %v968_v13 = vld [vmem:[%s1247_s2 + $0x28] sm:$0xff]  }
  0x13   :  { %820 = vmatpush3.bf16.msra.mxu0 %v943_v7  ;;  %851 = vmatprep.subr.bf16.mxu1 %v955_v18 }
  0x14   :  { %821 = vmatprep.subr.bf16.mxu0 %v944_v9 }
  0x16   :  { %852 = vmatpush3.bf16.msra.mxu1 %v955_v18 }
  0x17   :  { %822 = vmatpush3.bf16.msra.mxu0 %v944_v9  ;;  %853 = vmatprep.subr.bf16.mxu1 %v957_v22 }
  0x18   :  { %823 = vmatprep.subr.bf16.mxu0 %v945_v12 }
  0x1a   :  { %854 = vmatpush3.bf16.msra.mxu1 %v957_v22 }
  0x1b   :  { %824 = vmatpush3.bf16.msra.mxu0 %v945_v12  ;;  %855 = vmatprep.subr.bf16.mxu1 %v959_v25  ;;  %v967_v12 = vld [vmem:[%s1247_s2 + $0x20] sm:$0xff]  }
  0x1c   :  { %825 = vmatprep.subr.bf16.mxu0 %v946_v14 }
  0x1e   :  { %856 = vmatpush3.bf16.msra.mxu1 %v959_v25  ;;  %v762_v25 = vld [vmem:[%s1248_s4] ss:$0 sm:$0xff] }
  0x1f   :  { %826 = vmatpush3.bf16.msra.mxu0 %v946_v14  ;;  %857 = vmatprep.subr.bf16.mxu1 %v961_v46  ;;  %v969_v14 = vld [vmem:[%s1247_s2 + $0x30] sm:$0xff]  }
  0x20   :  { %875 = vmatprep.subr.bf16.mxu0 %v1061_v20 }
  0x22   :  { %828 = vmatmul.mubr.bf16.vlgmr.msra.gmra.mrb[0].mxu0 %v74_v21  ;;  %858 = vmatpush3.bf16.msra.mxu1 %v961_v46 }
  0x23   :  { %831 = vmatprep.mubr.bf16.mxu0 %v75_v23  ;;  %876 = vmatpush3.bf16.msra.mxu0 %v1061_v20 }
  0x24   :  { %877 = vmatprep.subr.bf16.mxu0 %v1070_v24  ;;  %907 = vmatprep.subr.bf16.mxu1 %v1061_v20 }
  0x27   :  { %878 = vmatpush3.bf16.msra.mxu0 %v1070_v24 }
  0x28   :  { %879 = vmatprep.subr.bf16.mxu0 %v1092_v30 }
  0x2a   :  { %832 = vmatmul.mubr.bf16.gmra.mrb[4].mxu0 %v76_v31 }
  0x2b   :  { %835 = vmatprep.mubr.bf16.mxu0 %v77_v32  ;;  %880 = vmatpush3.bf16.msra.mxu0 %v1092_v30 }
  0x2c   :  { %881 = vmatprep.subr.bf16.mxu0 %v1099_v33 }
  0x2f   :  { %882 = vmatpush3.bf16.msra.mxu0 %v1099_v33 }
  0x30   :  { %883 = vmatprep.subr.bf16.mxu0 %v1118_v38 }
  0x32   :  { %836 = vmatmul.mubr.bf16.gmra.mrb[8].mxu0 %v78_v39 }
  0x33   :  { %839 = vmatprep.mubr.bf16.mxu0 %v79_v40  ;;  %884 = vmatpush3.bf16.msra.mxu0 %v1118_v38 }
  0x34   :  { %885 = vmatprep.subr.bf16.mxu0 %v1125_v41 }
  0x37   :  { %886 = vmatpush3.bf16.msra.mxu0 %v1125_v41 }
  0x38   :  { %887 = vmatprep.subr.bf16.mxu0 %v1138_v44 }
  0x3a   :  { %840 = vmatmul.mubr.bf16.gmra.mrb[12].mxu0 %v80_v45 }
  0x3b   :  { %888 = vmatpush3.bf16.msra.mxu0 %v1138_v44  ;;  %891 = vmatprep.mubr.bf16.mxu0 %v963_v48 }
  0x3c   :  { %889 = vmatprep.subr.bf16.mxu0 %v1149_v47 }
  0x3f   :  { %890 = vmatpush3.bf16.msra.mxu0 %v1149_v47 }
  0x42   :  { %892 = vmatmul.mubr.bf16.vlgmr.msra.gmra.mrb[16].mxu0 %v964_v49 }
  0x43   :  { %895 = vmatprep.mubr.bf16.mxu0 %v965_v50 }
  0x4a   :  { %896 = vmatmul.mubr.bf16.gmra.mrb[20].mxu0 %v966_v51 }
  0xf5   :  { %v829_v52 = vpop.f32.mrb[0].mxu0 }
  0xf6   :  { %v179_v53 = vpop.f32.mrb[1].mxu0 }
  0xf7   :  { %v830_v54 = vpop.f32.mrb[2].mxu0 }
  0xf8   :  { %v326_v55 = vpack.c.bf16 %v830_v54, %v829_v52  ;;  %v182_v56 = vpop.f32.mrb[3].mxu0 }
  0xf9   :  { %v325_v57 = vpack.c.bf16 %v182_v56, %v179_v53 }
  0xfb   :  { %859 = vmatprep.mubr.bf16.mxu1 %v325_v57 }
  0xfc   :  { %860 = vmatmul.mubr.bf16.vlgmr.msra.gmra.mrb[0].mxu1 %v326_v55 }
  0xfd   :  { %915 = vmatpush3.bf16.msra.mxu1 %v1061_v20  ;;  %v833_v58 = vpop.f32.mrb[4].mxu0 }
  0xfe   :  { %v195_v59 = vpop.f32.mrb[5].mxu0  ;;  %908 = vmatprep.subr.bf16.mxu1 %v1070_v24 }
  0xff   :  { %v834_v60 = vpop.f32.mrb[6].mxu0 }
 0x100   :  { %v328_v61 = vpack.c.bf16 %v834_v60, %v833_v58  ;;  %v198_v62 = vpop.f32.mrb[7].mxu0 }
 0x101   :  { %v327_v63 = vpack.c.bf16 %v198_v62, %v195_v59  ;;  %916 = vmatpush3.bf16.msra.mxu1 %v1070_v24 }
 0x102   :  { %909 = vmatprep.subr.bf16.mxu1 %v1092_v30 }
 0x103   :  { %863 = vmatprep.mubr.bf16.mxu1 %v327_v63 }
 0x104   :  { %864 = vmatmul.mubr.bf16.gmra.mrb[4].mxu1 %v328_v61 }
 0x105   :  { %917 = vmatpush3.bf16.msra.mxu1 %v1092_v30  ;;  %v837_v0 = vpop.f32.mrb[8].mxu0 }
 0x106   :  { %v211_v1 = vpop.f32.mrb[9].mxu0  ;;  %910 = vmatprep.subr.bf16.mxu1 %v1099_v33 }
 0x107   :  { %v838_v2 = vpop.f32.mrb[10].mxu0 }
 0x108   :  { %v330_v3 = vpack.c.bf16 %v838_v2, %v837_v0  ;;  %v214_v4 = vpop.f32.mrb[11].mxu0 }
 0x109   :  { %v329_v5 = vpack.c.bf16 %v214_v4, %v211_v1  ;;  %918 = vmatpush3.bf16.msra.mxu1 %v1099_v33 }
 0x10a   :  { %911 = vmatprep.subr.bf16.mxu1 %v1118_v38 }
 0x10b   :  { %867 = vmatprep.mubr.bf16.mxu1 %v329_v5 }
 0x10c   :  { %868 = vmatmul.mubr.bf16.gmra.mrb[8].mxu1 %v330_v3 }
 0x10d   :  { %919 = vmatpush3.bf16.msra.mxu1 %v1118_v38  ;;  %v841_v6 = vpop.f32.mrb[12].mxu0 }
 0x10e   :  { %v227_v7 = vpop.f32.mrb[13].mxu0  ;;  %912 = vmatprep.subr.bf16.mxu1 %v1125_v41 }
 0x10f   :  { %v842_v8 = vpop.f32.mrb[14].mxu0 }
 0x110   :  { %v332_v9 = vpack.c.bf16 %v842_v8, %v841_v6  ;;  %v230_v10 = vpop.f32.mrb[15].mxu0 }
 0x111   :  { %v331_v11 = vpack.c.bf16 %v230_v10, %v227_v7  ;;  %920 = vmatpush3.bf16.msra.mxu1 %v1125_v41 }
 0x112   :  { %913 = vmatprep.subr.bf16.mxu1 %v1138_v44 }
 0x113   :  { %871 = vmatprep.mubr.bf16.mxu1 %v331_v11 }
 0x114   :  { %872 = vmatmul.mubr.bf16.gmra.mrb[12].mxu1 %v332_v9 }
 0x115   :  { %921 = vmatpush3.bf16.msra.mxu1 %v1138_v44  ;;  %899 = vmatprep.mubr.bf16.mxu1 %v967_v12  ;;  %v893_v16 = vpop.f32.mrb[16].mxu0 }
 0x116   :  { %914 = vmatprep.subr.bf16.mxu1 %v1149_v47  ;;  %v624_v17 = vpop.f32.mrb[17].mxu0 }
 0x117   :  { %v894_v18 = vpop.f32.mrb[18].mxu0 }
 0x118   :  { %v627_v19 = vpop.f32.mrb[19].mxu0 }
 0x119   :  { %922 = vmatpush3.bf16.msra.mxu1 %v1149_v47 }
 0x11c   :  { %900 = vmatmul.mubr.bf16.vlgmr.msra.gmra.mrb[8].mxu1 %v968_v13 }
 0x11d   :  { %903 = vmatprep.mubr.bf16.mxu1 %v969_v14  ;;  %v897_v20 = vpop.f32.mrb[20].mxu0 }
 0x11e   :  { %v640_v21 = vpop.f32.mrb[21].mxu0 }
 0x11f   :  { %v898_v22 = vpop.f32.mrb[22].mxu0 }
 0x120   :  { %v643_v23 = vpop.f32.mrb[23].mxu0 }
 0x124   :  { %904 = vmatmul.mubr.bf16.gmra.mrb[12].mxu1 %v970_v15 }
 0x1cf   :  { %v861_v24 = vpop.f32.mrb[0].mxu1 }
 0x1d0   :  { %v633_v26 = vadd.f32 %v893_v16, %v861_v24  ;;  %v431_v27 = vpop.f32.mrb[1].mxu1 }
 0x1d1   :  { %v625_v28 = vadd.f32 %v624_v17, %v431_v27  ;;  %v862_v29 = vpop.f32.mrb[2].mxu1 }
 0x1d2   :  { %v696_v30 = vadd.f32 %v762_v25, %v633_v26  ;;  %v636_v31 = vadd.f32 %v894_v18, %v862_v29  ;;  %v434_v32 = vpop.f32.mrb[3].mxu1 }
 0x1d3   :  { %v694_v33 = vadd.f32 %v762_v25, %v625_v28  ;;  %v628_v34 = vadd.f32 %v627_v19, %v434_v32 }
 0x1d4   :  { %712 = vst [vmem:[%s1249_s5 + $0x10] sm:$0xff] %v696_v30  ;;  %v697_v35 = vadd.f32 %v762_v25, %v636_v31 }
 0x1d5   :  { %710 = vst [vmem:[%s1249_s5] sm:$0xff] %v694_v33  ;;  %v695_v36 = vadd.f32 %v762_v25, %v628_v34 }
 0x1d6   :  { %713 = vst [vmem:[%s1249_s5 + $0x18] sm:$0xff] %v697_v35 }
 0x1d7   :  { %711 = vst [vmem:[%s1249_s5 + $0x8] sm:$0xff] %v695_v36  ;;  %v865_v37 = vpop.f32.mrb[4].mxu1 }
 0x1d8   :  { %v649_v38 = vadd.f32 %v897_v20, %v865_v37  ;;  %v447_v39 = vpop.f32.mrb[5].mxu1 }
 0x1d9   :  { %v641_v40 = vadd.f32 %v640_v21, %v447_v39  ;;  %v866_v41 = vpop.f32.mrb[6].mxu1 }
 0x1da   :  { %v700_v42 = vadd.f32 %v762_v25, %v649_v38  ;;  %v652_v43 = vadd.f32 %v898_v22, %v866_v41  ;;  %v450_v44 = vpop.f32.mrb[7].mxu1 }
 0x1db   :  { %v698_v45 = vadd.f32 %v762_v25, %v641_v40  ;;  %v644_v46 = vadd.f32 %v643_v23, %v450_v44 }
 0x1dc   :  { %716 = vst [vmem:[%s1249_s5 + $0x30] sm:$0xff] %v700_v42  ;;  %v701_v47 = vadd.f32 %v762_v25, %v652_v43 }
 0x1dd   :  { %714 = vst [vmem:[%s1249_s5 + $0x20] sm:$0xff] %v698_v45  ;;  %v699_v48 = vadd.f32 %v762_v25, %v644_v46 }
 0x1de   :  { %717 = vst [vmem:[%s1249_s5 + $0x38] sm:$0xff] %v701_v47 }
 0x1df   :  { %715 = vst [vmem:[%s1249_s5 + $0x28] sm:$0xff] %v699_v48 }
 0x1ef   :  { %v901_v49 = vpop.f32.mrb[8].mxu1 }
 0x1f0   :  { %v704_v50 = vadd.f32 %v901_v49, %v762_v25  ;;  %v656_v51 = vpop.f32.mrb[9].mxu1 }
 0x1f1   :  { %v702_v52 = vadd.f32 %v762_v25, %v656_v51  ;;  %v902_v53 = vpop.f32.mrb[10].mxu1 }
 0x1f2   :  { %720 = vst [vmem:[%s1249_s5 + $0x50] sm:$0xff] %v704_v50  ;;  %v705_v54 = vadd.f32 %v902_v53, %v762_v25  ;;  %v659_v55 = vpop.f32.mrb[11].mxu1 }
 0x1f3   :  { %718 = vst [vmem:[%s1249_s5 + $0x40] sm:$0xff] %v702_v52  ;;  %v703_v56 = vadd.f32 %v762_v25, %v659_v55 }
 0x1f4   :  { %721 = vst [vmem:[%s1249_s5 + $0x58] sm:$0xff] %v705_v54 }
 0x1f5   :  { %719 = vst [vmem:[%s1249_s5 + $0x48] sm:$0xff] %v703_v56 }
 0x1f7   :  { %v905_v57 = vpop.f32.mrb[12].mxu1 }
 0x1f8   :  { %v708_v58 = vadd.f32 %v905_v57, %v762_v25  ;;  %v672_v59 = vpop.f32.mrb[13].mxu1 }
 0x1f9   :  { %v706_v60 = vadd.f32 %v762_v25, %v672_v59  ;;  %v906_v61 = vpop.f32.mrb[14].mxu1 }
 0x1fa   :  { %724 = vst [vmem:[%s1249_s5 + $0x70] sm:$0xff] %v708_v58  ;;  %v709_v62 = vadd.f32 %v906_v61, %v762_v25  ;;  %v675_v63 = vpop.f32.mrb[15].mxu1 }
 0x1fb   :  { %722 = vst [vmem:[%s1249_s5 + $0x60] sm:$0xff] %v706_v60  ;;  %v707_v0 = vadd.f32 %v762_v25, %v675_v63 }
 0x1fc   :  { %725 = vst [vmem:[%s1249_s5 + $0x78] sm:$0xff] %v709_v62 }
 0x1fd   :  { %723 = vst [vmem:[%s1249_s5 + $0x68] sm:$0xff] %v707_v0 }

</bundles_post_ra>
